<compile_context>
chip_gen: v7x
topology: tpu7x:2x2x1
jax: 0.10.0
libtpu: 0.0.40
codegen_flags: <defaults>
</compile_context>

<pallas_src>
import jax
import jax.numpy as jnp
from jax.experimental import pallas as pl
from jax.experimental.pallas import tpu as pltpu

IN_FEATURES = 4     # input_shape in the PyTorch module
H = 128             # hidden width
OUT_FEATURES = 5    # output_shape (number of actions)
OUT_PAD = 8         # kernel output lane width (columns 5..7 are zero, sliced off outside)


def _round_up(n, m):
    return ((n + m - 1) // m) * m


def dqn_mlp_kernel(x_ref, w1_ref, b1_ref, w2_ref, b2_ref, o_ref):
    """o = relu(x @ W1 + b1) @ W2_pad + b2_pad, all accumulation in f32."""
    h = jnp.dot(x_ref[...], w1_ref[...], preferred_element_type=jnp.float32)
    h = jnp.maximum(h + b1_ref[...], 0.0)               # f32 VPU ReLU (v5e-safe)
    out = jnp.dot(h.astype(w2_ref.dtype), w2_ref[...],
                  preferred_element_type=jnp.float32)
    o_ref[...] = (out + b2_ref[...]).astype(o_ref.dtype)


def prepare_params(w1, b1, w2, b2, dtype=jnp.float32):
    """Pack kernel operands.

    w1: (4, 128), b1: (128,), w2: (128, 5), b2: (5,)  [(in, out) layout]
    Returns:
      w1   (4, 128)    dtype   (use dtype=jnp.bfloat16 on v6e/v7x to halve weight/x bytes)
      b1   (1, 128)    f32     (biases stay f32 for parity with the PyTorch reference)
      w2p  (128, 8)    dtype   (columns 5..7 zero)
      b2p  (1, 8)      f32     (columns 5..7 zero)
    """
    w2p = jnp.zeros((H, OUT_PAD), jnp.float32).at[:, :OUT_FEATURES].set(
        w2.astype(jnp.float32))
    b2p = jnp.zeros((1, OUT_PAD), jnp.float32).at[0, :OUT_FEATURES].set(
        b2.astype(jnp.float32))
    return (w1.astype(dtype),
            b1.astype(jnp.float32).reshape(1, H),
            w2p.astype(dtype),
            b2p)


def dqn_forward_pallas(x, params, *, tile_b=4096, return_padded=False):
    """x: (B, 4) -> Q-values (B, 5) float32 (or (B, 8) padded if return_padded)."""
    w1, b1, w2p, b2p = params
    B = x.shape[0]
    x = x.astype(w1.dtype)

    # Batch tile: sublane-aligned, capped at 8192 rows (keeps the (tile_b, 128) f32
    # hidden intermediate + double-buffered I/O a few MiB, inside v7x's VMEM), and
    # split so the grid has >= 2 tiles whenever the batch allows it (megacore sharding).
    b8 = _round_up(max(B, 1), 8)
    tile_b = max(8, min(_round_up(tile_b, 8), 8192, b8))
    if b8 >= 16 and tile_b >= b8:
        tile_b = _round_up((b8 + 1) // 2, 8)
    grid = (pl.cdiv(B, tile_b),)

    out = pl.pallas_call(
        dqn_mlp_kernel,
        out_shape=jax.ShapeDtypeStruct((B, OUT_PAD), jnp.float32),
        grid=grid,
        in_specs=[
            pl.BlockSpec((tile_b, IN_FEATURES), lambda i: (i, 0)),  # streamed batch tiles
            pl.BlockSpec((IN_FEATURES, H), lambda i: (0, 0)),       # resident weights
            pl.BlockSpec((1, H), lambda i: (0, 0)),                 # resident bias 1
            pl.BlockSpec((H, OUT_PAD), lambda i: (0, 0)),           # resident weights
            pl.BlockSpec((1, OUT_PAD), lambda i: (0, 0)),           # resident bias 2
        ],
        out_specs=pl.BlockSpec((tile_b, OUT_PAD), lambda i: (i, 0)),
        compiler_params=pltpu.CompilerParams(
            dimension_semantics=("parallel",),     # shard batch tiles across TCs on v7x
            vmem_limit_bytes=32 * 1024 * 1024,
        ),
    )(x, w1, b1, w2p, b2p)
    return out if return_padded else out[:, :OUT_FEATURES]


def _dqn_forward_xla(x, params):
    """Plain-XLA path for tiny (act/best_action) batches where dispatch latency dominates."""
    w1, b1, w2p, b2p = params
    h = jnp.maximum(x.astype(jnp.float32) @ w1.astype(jnp.float32) + b1, 0.0)
    return (h @ w2p.astype(jnp.float32) + b2p)[:, :OUT_FEATURES]


def dqn_forward(x, params, *, tile_b=4096, small_batch_threshold=64):
    if x.shape[0] <= small_batch_threshold:
        return _dqn_forward_xla(x, params)
    return dqn_forward_pallas(x, params, tile_b=tile_b)


# TODO(synk): act()/best_action() epsilon-greedy branching and .item() are host-side
# control flow; they stay outside the kernel (an in-kernel argmax epilogue could be
# fused for the greedy path if desired).


if __name__ == "__main__":
    key = jax.random.PRNGKey(0)
    k1, k2, k3, k4, kx1, kx2 = jax.random.split(key, 6)

    s1 = 1.0 / jnp.sqrt(IN_FEATURES)
    s2 = 1.0 / jnp.sqrt(H)
    w1 = jax.random.uniform(k1, (IN_FEATURES, H), jnp.float32, -s1, s1)
    b1 = jax.random.uniform(k2, (H,), jnp.float32, -s1, s1)
    w2 = jax.random.uniform(k3, (H, OUT_FEATURES), jnp.float32, -s2, s2)
    b2 = jax.random.uniform(k4, (OUT_FEATURES,), jnp.float32, -s2, s2)
    params = prepare_params(w1, b1, w2, b2)  # f32; pass dtype=jnp.bfloat16 on v6e/v7x

    def ref_fn(xv):
        return jnp.maximum(xv @ w1 + b1[None, :], 0.0) @ w2 + b2[None, :]

    # Small (act/best_action-style) batch directly through the Pallas kernel.
    x_small = jax.random.normal(kx1, (2, IN_FEATURES), jnp.float32)
    out_small = jax.block_until_ready(dqn_forward_pallas(x_small, params))
    assert out_small.shape == (2, OUT_FEATURES)
    assert jnp.allclose(out_small, ref_fn(x_small), atol=1e-5, rtol=1e-5)

    # Multi-tile batch with a partial last block (B=300, tile_b=128 -> grid=(3,)).
    x_big = jax.random.normal(kx2, (300, IN_FEATURES), jnp.float32)
    out_big = jax.block_until_ready(dqn_forward_pallas(x_big, params, tile_b=128))
    assert out_big.shape == (300, OUT_FEATURES)
    assert jnp.allclose(out_big, ref_fn(x_big), atol=1e-5, rtol=1e-5)

    # Dispatcher path: tiny batch falls back to plain XLA, big batch uses Pallas.
    out_disp_small = jax.block_until_ready(dqn_forward(x_small, params))
    out_disp_big = jax.block_until_ready(dqn_forward(x_big, params, tile_b=128))
    assert jnp.allclose(out_disp_small, ref_fn(x_small), atol=1e-5, rtol=1e-5)
    assert jnp.allclose(out_disp_big, ref_fn(x_big), atol=1e-5, rtol=1e-5)

    print("KERNEL_OK")
</pallas_src>

<mosaic_0001>
module attributes {stable_mosaic.version = 11 : i64} {
  func.func @dqn_mlp_kernel(%arg0: i32, %arg1: memref<8x4xf32, #tpu.memory_space<vmem>>, %arg2: memref<4x128xf32, #tpu.memory_space<vmem>>, %arg3: memref<1x128xf32, #tpu.memory_space<vmem>>, %arg4: memref<128x8xf32, #tpu.memory_space<vmem>>, %arg5: memref<1x8xf32, #tpu.memory_space<vmem>>, %arg6: memref<8x8xf32, #tpu.memory_space<vmem>>) attributes {dimension_semantics = [#tpu.dimension_semantics<parallel>], iteration_bounds = array<i64: 1>, scalar_prefetch = 0 : i64, scratch_operands = 0 : i64, tpu.core_type = #tpu.core_type<tc>, window_params = [{transform_indices = @transform_0, window_bounds = array<i64: 8, 4>}, {pipeline_mode = #tpu.pipeline_mode<synchronous>, transform_indices = @transform_1, window_bounds = array<i64: 4, 128>}, {pipeline_mode = #tpu.pipeline_mode<synchronous>, transform_indices = @transform_2, window_bounds = array<i64: 1, 128>}, {pipeline_mode = #tpu.pipeline_mode<synchronous>, transform_indices = @transform_3, window_bounds = array<i64: 128, 8>}, {pipeline_mode = #tpu.pipeline_mode<synchronous>, transform_indices = @transform_4, window_bounds = array<i64: 1, 8>}, {transform_indices = @transform_5, window_bounds = array<i64: 8, 8>}]} {
    %c0 = arith.constant 0 : index
    %c0_0 = arith.constant 0 : index
    %0 = vector.load %arg1[%c0, %c0_0] : memref<8x4xf32, #tpu.memory_space<vmem>>, vector<8x4xf32>
    %c0_1 = arith.constant 0 : index
    %c0_2 = arith.constant 0 : index
    %1 = vector.load %arg2[%c0_1, %c0_2] : memref<4x128xf32, #tpu.memory_space<vmem>>, vector<4x128xf32>
    %cst = arith.constant dense<0.000000e+00> : vector<8x128xf32>
    %2 = tpu.matmul %0, %1, %cst {dimension_numbers = #tpu.dot_dimension_numbers<[1], [0], [0], [1], [0, 0, 1, 1], [], []>} : vector<8x4xf32>, vector<4x128xf32>, vector<8x128xf32> -> vector<8x128xf32>
    %c0_3 = arith.constant 0 : index
    %c0_4 = arith.constant 0 : index
    %3 = vector.load %arg3[%c0_3, %c0_4] : memref<1x128xf32, #tpu.memory_space<vmem>>, vector<1x128xf32>
    %4 = vector.broadcast %3 : vector<1x128xf32> to vector<8x128xf32>
    %5 = arith.addf %2, %4 : vector<8x128xf32>
    %cst_5 = arith.constant 0.000000e+00 : f32
    %6 = vector.broadcast %cst_5 : f32 to vector<8x128xf32>
    %7 = arith.maximumf %5, %6 : vector<8x128xf32>
    %c0_6 = arith.constant 0 : index
    %c0_7 = arith.constant 0 : index
    %8 = vector.load %arg4[%c0_6, %c0_7] : memref<128x8xf32, #tpu.memory_space<vmem>>, vector<128x8xf32>
    %cst_8 = arith.constant dense<0.000000e+00> : vector<8x8xf32>
    %9 = tpu.matmul %7, %8, %cst_8 {dimension_numbers = #tpu.dot_dimension_numbers<[1], [0], [0], [1], [0, 0, 1, 1], [], []>} : vector<8x128xf32>, vector<128x8xf32>, vector<8x8xf32> -> vector<8x8xf32>
    %c0_9 = arith.constant 0 : index
    %c0_10 = arith.constant 0 : index
    %10 = vector.load %arg5[%c0_9, %c0_10] : memref<1x8xf32, #tpu.memory_space<vmem>>, vector<1x8xf32>
    %11 = vector.broadcast %10 : vector<1x8xf32> to vector<8x8xf32>
    %12 = arith.addf %9, %11 : vector<8x8xf32>
    %c0_11 = arith.constant 0 : index
    %c0_12 = arith.constant 0 : index
    %13 = vector.load %arg6[%c0_11, %c0_12] : memref<8x8xf32, #tpu.memory_space<vmem>>, vector<8x8xf32>
    tpu.vector_store %arg6[%c0_11, %c0_12], %12 {strides = array<i32>} : memref<8x8xf32, #tpu.memory_space<vmem>>, vector<8x8xf32>,
    return
  }
  func.func @transform_0(%arg0: i32) -> (i32, i32) {
    %c0_i32 = arith.constant 0 : i32
    %c0_i32_0 = arith.constant 0 : i32
    return %arg0, %c0_i32 : i32, i32
  }
  func.func @transform_1(%arg0: i32) -> (i32, i32) {
    %c0_i32 = arith.constant 0 : i32
    %c0_i32_0 = arith.constant 0 : i32
    %c0_i32_1 = arith.constant 0 : i32
    return %c0_i32, %c0_i32_0 : i32, i32
  }
  func.func @transform_2(%arg0: i32) -> (i32, i32) {
    %c0_i32 = arith.constant 0 : i32
    %c0_i32_0 = arith.constant 0 : i32
    %c0_i32_1 = arith.constant 0 : i32
    return %c0_i32, %c0_i32_0 : i32, i32
  }
  func.func @transform_3(%arg0: i32) -> (i32, i32) {
    %c0_i32 = arith.constant 0 : i32
    %c0_i32_0 = arith.constant 0 : i32
    %c0_i32_1 = arith.constant 0 : i32
    return %c0_i32, %c0_i32_0 : i32, i32
  }
  func.func @transform_4(%arg0: i32) -> (i32, i32) {
    %c0_i32 = arith.constant 0 : i32
    %c0_i32_0 = arith.constant 0 : i32
    %c0_i32_1 = arith.constant 0 : i32
    return %c0_i32, %c0_i32_0 : i32, i32
  }
  func.func @transform_5(%arg0: i32) -> (i32, i32) {
    %c0_i32 = arith.constant 0 : i32
    %c0_i32_0 = arith.constant 0 : i32
    return %arg0, %c0_i32 : i32, i32
  }
}

</mosaic_0001>

<bundles_post_ra>
// kernel: tpu_custom_call.1
= control target key start
LH: loop header
LB: loop body
LE: loop exit
PB: predicated region body
PF: predicated region fallthrough
CT: control target
= control target key end

     0   :  { %10 = vsyncpa [#allocation3], 0  ;;  %vm34_vm0 = vcmask 1043456   ;;  %v337_v1 = vmov 0.0   ;;  %vm30_vm1 = vcmask 31744   ;;  %vm338_vm2 = vmmov 0   ;;  %s445_s0 = inlined_call_operand.vmem [shape: f32[2,4], index: 0, kind: input, shape index: {}]   ;;  %s446_s1 = inlined_call_operand.vmem [shape: f32[4,128], index: 1, kind: input, shape index: {}]   ;;  %s447_s2 = inlined_call_operand.vmem [shape: f32[1,128], index: 2, kind: input, shape index: {}]   ;;  %s448_s3 = inlined_call_operand.vmem [shape: f32[128,8], index: 3, kind: input, shape index: {}]   ;;  %s449_s4 = inlined_call_operand.vmem [shape: f32[1,8], index: 4, kind: input, shape index: {}]   ;;  %s450_s5 = inlined_call_operand.hbm [shape: f32[2,8], index: 5, kind: output, shape index: {}]  }
   0x1   :  { %v22_v0 = vld [vmem:[%s446_s1] sm:$0xf]  ;;  %243 = vmatprep.subr.mxu0 %v337_v1  ;;  %v110_v4 = vld [vmem:[%s448_s3 + $0x8] sm:$0xff]  ;;  %245 = vmatprep.mubr.msk.f32.mxu0 %vm338_vm2, %v337_v1  ;;  %v111_v6 = vld [vmem:[%s448_s3 + $0x10] sm:$0xff]  ;;  %v339_v8 = vmov 0.0|0.0   ;;  %vm202_vm3 = vcmask 64512  }
   0x2   :  { %v21_v2 = vld [vmem:[%s445_s0] sm:$0xff]  ;;  %244 = vmatpush3.msk.msra.mxu0 %vm34_vm0, %v22_v0  ;;  %v112_v7 = vld [vmem:[%s448_s3 + $0x18] sm:$0xff]  ;;  %283 = vmatprep.subr.bf16.mxu1 %v339_v8  ;;  %v114_v11 = vld [vmem:[%s448_s3 + $0x28] sm:$0xff] }
   0x3   :  { %v109_v3 = vld [vmem:[%s448_s3] sm:$0xff]  ;;  %246 = vmatmul.mubr.msk.f32.vlgmr.msra.gmra.mrb[0].mxu0 %vm30_vm1, %v21_v2  ;;  %v287_v9 = vpack.c.bf16 %v112_v7, %v111_v6  ;;  %280 = vmatprep.mubr.msk.f32.mxu1 %vm338_vm2, %v337_v1  ;;  %v115_v13 = vld [vmem:[%s448_s3 + $0x30] sm:$0xff]  ;;  %v116_v14 = vld [vmem:[%s448_s3 + $0x38] sm:$0xff] }
   0x4   :  { %v284_v5 = vpack.c.bf16 %v110_v4, %v109_v3  ;;  %v113_v10 = vld [vmem:[%s448_s3 + $0x20] sm:$0xff]  ;;  %v293_v15 = vpack.c.bf16 %v116_v14, %v115_v13  ;;  %v118_v17 = vld [vmem:[%s448_s3 + $0x48] sm:$0xff]  ;;  %v119_v19 = vld [vmem:[%s448_s3 + $0x50] sm:$0xff] }
   0x5   :  { %v290_v12 = vpack.c.bf16 %v114_v11, %v113_v10  ;;  %v117_v16 = vld [vmem:[%s448_s3 + $0x40] sm:$0xff]  ;;  %v120_v20 = vld [vmem:[%s448_s3 + $0x58] sm:$0xff]  ;;  %v122_v23 = vld [vmem:[%s448_s3 + $0x68] sm:$0xff] }
   0x6   :  { %285 = vmatpush3.bf16.msra.mxu1 %v284_v5  ;;  %v296_v18 = vpack.c.bf16 %v118_v17, %v117_v16  ;;  %v299_v21 = vpack.c.bf16 %v120_v20, %v119_v19  ;;  %v121_v22 = vld [vmem:[%s448_s3 + $0x60] sm:$0xff]  ;;  %v123_v25 = vld [vmem:[%s448_s3 + $0x70] sm:$0xff]  ;;  %v124_v26 = vld [vmem:[%s448_s3 + $0x78] sm:$0xff] }
   0x7   :  { %286 = vmatprep.subr.bf16.mxu1 %v339_v8  ;;  %v302_v24 = vpack.c.bf16 %v122_v23, %v121_v22  ;;  %v305_v27 = vpack.c.bf16 %v124_v26, %v123_v25  ;;  %v220_v28 = vld [vmem:[%s447_s2] ss:$0 sm:$0xff] }
   0x8   :  { %v223_v33 = vld [vmem:[%s449_s4] ss:$0 sm:$0xff] }
   0xa   :  { %288 = vmatpush3.bf16.msra.mxu1 %v287_v9 }
   0xb   :  { %289 = vmatprep.subr.bf16.mxu1 %v339_v8 }
   0xe   :  { %291 = vmatpush3.bf16.msra.mxu1 %v290_v12 }
   0xf   :  { %292 = vmatprep.subr.bf16.mxu1 %v339_v8 }
  0x12   :  { %294 = vmatpush3.bf16.msra.mxu1 %v293_v15 }
  0x13   :  { %295 = vmatprep.subr.bf16.mxu1 %v339_v8 }
  0x16   :  { %297 = vmatpush3.bf16.msra.mxu1 %v296_v18 }
  0x17   :  { %298 = vmatprep.subr.bf16.mxu1 %v339_v8 }
  0x1a   :  { %300 = vmatpush3.bf16.msra.mxu1 %v299_v21 }
  0x1b   :  { %301 = vmatprep.subr.bf16.mxu1 %v339_v8 }
  0x1e   :  { %303 = vmatpush3.bf16.msra.mxu1 %v302_v24 }
  0x1f   :  { %304 = vmatprep.subr.bf16.mxu1 %v339_v8 }
  0x22   :  { %306 = vmatpush3.bf16.msra.mxu1 %v305_v27 }
  0xd6   :  { %v104_v29 = vpop.f32.mrb[0].mxu0 }
  0xd7   :  { %v105_v30 = vadd.f32 %v220_v28, %v104_v29  ;;  %v247_v31 = vpop.f32.mrb[1].mxu0 }
  0xd9   :  { %v108_v32 = vmax.f32 %v105_v30, 0.0 }
  0xdb   :  { %281 = vmatmul.mubr.f32.vlgmr.msra.gmra.mrb[0].mxu1 %v108_v32 }
 0x1ae   :  { %v198_v34 = vpop.f32.mrb[0].mxu1 }
 0x1af   :  { %v199_v35 = vadd.f32 %v223_v33, %v198_v34  ;;  %v282_v36 = vpop.f32.mrb[1].mxu1 }
 0x1b1   :  { %203 = vst.msk [vmem:[#allocation2] sm:$0xff] %vm202_vm3, %v199_v35 }
 0x1b2   :  { %208 = vsyncadd [#allocation3], 96  ;;  %s340_s3 = smov [#allocation2]  }
 0x1b3   :  { %s209_s29 = sshll.u32 %s340_s3, 4  ;;  %s210_s29 = int_to_ptr.vmem [resolvable:$true] %s209_s29 }
 0x1b4   :  { %s313_s30 = scalar_lea.vmem %s210_s29, 32  ;;  %s317_s2 = scalar_lea.vmem %s210_s29, 128 }
 0x1b5   :  { %p314_p0 = scmp.ne.s32.totalorder %s210_s29, %s313_s30  ;;  %p318_p1 = scmp.lt.s32.totalorder %s210_s29, %s210_s29 }
 0x1b6   :  { %p319_p2 = scmp.lt.s32.totalorder %s317_s2, %s313_s30 }
 0x1b8   :  { %p320_p3 = por %p319_p2, %p318_p1 }
 0x1ba   :  { %p321_p4 = pnand %p320_p3, %p314_p0 }
 0x1bc   :  { %324 = shalt.err (!%p321_p4)
}
 0x1bd   :  { %s325_s4 = scalar_lea.hbm %s450_s5, 32 }
 0x1be   :  { %p326_p5 = scmp.ne.s32.totalorder %s450_s5, %s325_s4  ;;  %p329_p6 = scmp.lt.u32.totalorder %s325_s4, %s450_s5 }
 0x1c0   :  { %p331_p7 = pnand %p329_p6, %p326_p5 }
 0x1c2   :  { %334 = shalt.err (!%p331_p7)
}
 0x1c3   :  { %s341_s12 = smov 32   ;;  %s342_s13 = smov 2  }
 0x1c4   :  { %215 = dma.vmem_to_hbm [thread:$0]  %s210_s29, 32, %s450_s5, [#allocation3], %s341_s12, %s341_s12, %s342_s13  }
 0x1c5   :  { %335 = dma.done.wait [#allocation3], 128  }
 0x1c6   :  { %336 = vsyncadd [#allocation3], 4294967168 }
 0x1c7   :  { %219 = vsyncpa [#allocation3], 1 }

</bundles_post_ra>
